<compile_context>
chip_gen: v5e
topology: v5e:2x2
jax: 0.10.0
libtpu: 0.0.40
codegen_flags: <defaults>
</compile_context>

<pallas_src>
import math

import jax
import jax.numpy as jnp
from jax.experimental import pallas as pl
from jax.experimental.pallas import tpu as pltpu


def _round_up(n, m):
    return ((n + m - 1) // m) * m


def _vmem_capacity_bytes():
    try:
        info = pltpu.get_tpu_info()
        cap = getattr(info, "vmem_capacity_bytes", None)
        if cap:
            return int(cap)
    except Exception:
        pass
    return 64 * 1024 * 1024  # conservative default (v7x per-TC VMEM)


def _fx_kernel(x_ref, w1_ref, b1_ref, w2_ref, b2_ref, feat_ref, out_ref):
    # x_ref:    (TB, Dp)    f32 streamed batch tile (cast to bf16 in-kernel)
    # w1_ref:   (Dp, HIDp)  bf16 resident feature-extractor weight
    # b1_ref:   (1, HIDp)   f32  resident
    # w2_ref:   (HIDp, NCp) bf16 resident classifier weight
    # b2_ref:   (1, NCp)    f32  resident
    # feat_ref: (TB, HIDp)  bf16 stored features (self.features)
    # out_ref:  (TB, NCp)   f32  logits
    x_bf = x_ref[...].astype(jnp.bfloat16)
    h = jnp.dot(x_bf, w1_ref[...], preferred_element_type=jnp.float32)
    h = jnp.maximum(h + b1_ref[...], 0.0)                 # ReLU
    h_bf = h.astype(jnp.bfloat16)
    feat_ref[...] = h_bf                                  # <- self.features (bf16)
    out_ref[...] = (
        jnp.dot(h_bf, w2_ref[...], preferred_element_type=jnp.float32)
        + b2_ref[...]
    )


def prepare_params(w1, b1, w2, b2):
    """One-time parameter prep (padding to 128 lanes + bf16 cast), hoisted out
    of the per-call path so repeated forward passes do not re-pad the weights."""
    D, HID = int(w1.shape[0]), int(w1.shape[1])
    NCLS = int(w2.shape[1])
    Dp = _round_up(D, 128)
    HIDp = _round_up(HID, 128)
    NCp = _round_up(NCLS, 128)
    w1_p = jnp.zeros((Dp, HIDp), jnp.bfloat16).at[:D, :HID].set(w1.astype(jnp.bfloat16))
    w2_p = jnp.zeros((HIDp, NCp), jnp.bfloat16).at[:HID, :NCLS].set(w2.astype(jnp.bfloat16))
    b1_p = jnp.zeros((1, HIDp), jnp.float32).at[0, :HID].set(b1.astype(jnp.float32))
    b2_p = jnp.zeros((1, NCp), jnp.float32).at[0, :NCLS].set(b2.astype(jnp.float32))
    return dict(w1=w1_p, b1=b1_p, w2=w2_p, b2=b2_p,
                D=D, HID=HID, NCLS=NCLS, Dp=Dp, HIDp=HIDp, NCp=NCp)


def feature_extractor_model(x_nchw, params, *, slice_outputs=True):
    """Runs feature_extractor + train_classifier; returns (logits, features)."""
    B = int(x_nchw.shape[0])
    D, HID, NCLS = params["D"], params["HID"], params["NCLS"]
    Dp, HIDp, NCp = params["Dp"], params["HIDp"], params["NCp"]
    assert int(math.prod(x_nchw.shape[1:])) == D

    # Flatten NCHW row-major (matches torch.flatten) -- a free reshape, no copy.
    x_flat = x_nchw.reshape(B, D).astype(jnp.float32)

    # Batch padded only to the next multiple of 8 sublanes (<= 7 rows); the
    # reduction (K) axis MUST be zero-padded when D % 128 != 0.
    B8 = _round_up(B, 8)
    pad_b, pad_d = B8 - B, Dp - D
    if pad_b or pad_d:
        x_flat = jnp.pad(x_flat, ((0, pad_b), (0, pad_d)))

    # --- generation-aware VMEM budget and batch-tile selection ---
    vmem_cap = _vmem_capacity_bytes()
    vmem_limit = min(int(vmem_cap * 0.75), 100 * 1024 * 1024)   # ~48MiB v7x, ~96MiB v5e/v6e
    budget = int(vmem_limit * 0.85)
    max_tb = 512 if vmem_cap >= 100 * 1024 * 1024 else 256

    if B8 > 8:
        # At least 2 grid steps so both v7x TensorCores get a batch shard.
        TB = min(max_tb, _round_up(pl.cdiv(B8, 2), 8))
    else:
        TB = 8

    def _vmem_bytes(tb):
        x_b = 2 * tb * Dp * 4                                        # x f32, double-buffered
        w_b = Dp * HIDp * 2 + HIDp * NCp * 2 + (HIDp + NCp) * 4      # resident, single-buffered
        o_b = 2 * tb * (HIDp * 2 + NCp * 4)                          # feats bf16 + logits f32
        h_b = tb * HIDp * 4                                          # f32 intermediate
        return x_b + w_b + o_b + h_b

    while TB > 8 and _vmem_bytes(TB) > budget:
        TB = max(8, _round_up(TB // 2, 8))
    # TODO(synk): add a K-axis reduction grid (f32 VMEM accumulator with pl.when
    # init/finalize) if the resident w1 alone ever exceeds the VMEM budget.

    grid = (pl.cdiv(B8, TB),)

    cost = pl.CostEstimate(
        flops=2 * B8 * Dp * HIDp + 2 * B8 * HIDp * NCp,
        transcendentals=0,
        bytes_accessed=(B8 * Dp * 4 + Dp * HIDp * 2 + HIDp * NCp * 2
                        + (HIDp + NCp) * 4 + B8 * HIDp * 2 + B8 * NCp * 4),
    )

    resident = pl.Buffered(1)   # constant index_map -> no double-buffering needed
    feats_p, logits_p = pl.pallas_call(
        _fx_kernel,
        out_shape=(
            jax.ShapeDtypeStruct((B8, HIDp), jnp.bfloat16),   # stored features
            jax.ShapeDtypeStruct((B8, NCp), jnp.float32),     # classifier logits
        ),
        grid_spec=pltpu.PrefetchScalarGridSpec(
            num_scalar_prefetch=0,
            grid=grid,
            in_specs=[
                pl.BlockSpec((TB, Dp), lambda i: (i, 0)),                         # x streams
                pl.BlockSpec((Dp, HIDp), lambda i: (0, 0), pipeline_mode=resident),
                pl.BlockSpec((1, HIDp), lambda i: (0, 0), pipeline_mode=resident),
                pl.BlockSpec((HIDp, NCp), lambda i: (0, 0), pipeline_mode=resident),
                pl.BlockSpec((1, NCp), lambda i: (0, 0), pipeline_mode=resident),
            ],
            out_specs=[
                pl.BlockSpec((TB, HIDp), lambda i: (i, 0)),
                pl.BlockSpec((TB, NCp), lambda i: (i, 0)),
            ],
        ),
        compiler_params=pltpu.CompilerParams(
            dimension_semantics=("parallel",),    # shard batch tiles over TCs
            vmem_limit_bytes=vmem_limit,
        ),
        cost_estimate=cost,
    )(x_flat, params["w1"], params["b1"], params["w2"], params["b2"])

    if slice_outputs:
        feats = feats_p[:B, :HID] if (B8 != B or HIDp != HID) else feats_p
        logits = logits_p[:B, :NCLS] if (B8 != B or NCp != NCLS) else logits_p
    else:
        feats, logits = feats_p, logits_p
    return logits, feats


if __name__ == "__main__":
    B, C, H, W = 2, 4, 16, 16
    HID, NCLS = 32, 10
    D = C * H * W

    key = jax.random.PRNGKey(0)
    kx, kw1, kb1, kw2, kb2 = jax.random.split(key, 5)

    x = jax.random.normal(kx, (B, C, H, W), dtype=jnp.float32)
    # Deterministic parameter init (PyTorch-like uniform scaling by fan-in).
    w1 = jax.random.uniform(kw1, (D, HID), jnp.float32, -1.0, 1.0) / jnp.sqrt(D)
    b1 = jax.random.uniform(kb1, (HID,), jnp.float32, -1.0, 1.0) / jnp.sqrt(D)
    w2 = jax.random.uniform(kw2, (HID, NCLS), jnp.float32, -1.0, 1.0) / jnp.sqrt(HID)
    b2 = jax.random.uniform(kb2, (NCLS,), jnp.float32, -1.0, 1.0) / jnp.sqrt(HID)

    params = prepare_params(w1, b1, w2, b2)   # one-time prep, out of the hot path
    logits, feats = feature_extractor_model(x, params)
    jax.block_until_ready((logits, feats))

    # Reference mirroring kernel numerics (bf16 operands, f32 accumulation;
    # features stored in bf16 and fed to the classifier, matching the module's
    # "self.features -> train_classifier" dataflow).
    xb = x.reshape(B, D).astype(jnp.bfloat16).astype(jnp.float32)
    w1b = w1.astype(jnp.bfloat16).astype(jnp.float32)
    w2b = w2.astype(jnp.bfloat16).astype(jnp.float32)
    h_emul = jnp.maximum(xb @ w1b + b1, 0.0)
    h_bf = h_emul.astype(jnp.bfloat16).astype(jnp.float32)
    out_emul = h_bf @ w2b + b2
    assert jnp.allclose(feats.astype(jnp.float32), h_bf, atol=1e-2, rtol=1e-2)
    assert jnp.allclose(logits, out_emul, atol=2e-2, rtol=1e-2)

    # Loose check against pure-f32 math (semantic sanity vs. the PyTorch module).
    h_f32 = jnp.maximum(x.reshape(B, D) @ w1 + b1, 0.0)
    out_f32 = h_f32 @ w2 + b2
    assert jnp.allclose(feats.astype(jnp.float32), h_f32, atol=5e-2, rtol=5e-2)
    assert jnp.allclose(logits, out_f32, atol=5e-2, rtol=5e-2)

    print("KERNEL_OK")
</pallas_src>

<mosaic_0001>
module attributes {stable_mosaic.version = 11 : i64} {
  func.func @_fx_kernel(%arg0: i32, %arg1: memref<8x1024xf32, #tpu.memory_space<vmem>>, %arg2: memref<1024x128xbf16, #tpu.memory_space<vmem>>, %arg3: memref<1x128xf32, #tpu.memory_space<vmem>>, %arg4: memref<128x128xbf16, #tpu.memory_space<vmem>>, %arg5: memref<1x128xf32, #tpu.memory_space<vmem>>, %arg6: memref<8x128xbf16, #tpu.memory_space<vmem>>, %arg7: memref<8x128xf32, #tpu.memory_space<vmem>>) attributes {dimension_semantics = [#tpu.dimension_semantics<parallel>], iteration_bounds = array<i64: 1>, scalar_prefetch = 0 : i64, scratch_operands = 0 : i64, tpu.core_type = #tpu.core_type<tc>, window_params = [{transform_indices = @transform_0, window_bounds = array<i64: 8, 1024>}, {pipeline_mode = #tpu.pipeline_mode<synchronous>, transform_indices = @transform_1, window_bounds = array<i64: 1024, 128>}, {pipeline_mode = #tpu.pipeline_mode<synchronous>, transform_indices = @transform_2, window_bounds = array<i64: 1, 128>}, {pipeline_mode = #tpu.pipeline_mode<synchronous>, transform_indices = @transform_3, window_bounds = array<i64: 128, 128>}, {pipeline_mode = #tpu.pipeline_mode<synchronous>, transform_indices = @transform_4, window_bounds = array<i64: 1, 128>}, {transform_indices = @transform_5, window_bounds = array<i64: 8, 128>}, {transform_indices = @transform_6, window_bounds = array<i64: 8, 128>}]} {
    %c0 = arith.constant 0 : index
    %c0_0 = arith.constant 0 : index
    %0 = vector.load %arg1[%c0, %c0_0] : memref<8x1024xf32, #tpu.memory_space<vmem>>, vector<8x1024xf32>
    %1 = arith.truncf %0 : vector<8x1024xf32> to vector<8x1024xbf16>
    %c0_1 = arith.constant 0 : index
    %c0_2 = arith.constant 0 : index
    %2 = vector.load %arg2[%c0_1, %c0_2] : memref<1024x128xbf16, #tpu.memory_space<vmem>>, vector<1024x128xbf16>
    %cst = arith.constant dense<0.000000e+00> : vector<8x128xf32>
    %3 = tpu.matmul %1, %2, %cst {dimension_numbers = #tpu.dot_dimension_numbers<[1], [0], [0], [1], [0, 0, 1, 1], [], []>} : vector<8x1024xbf16>, vector<1024x128xbf16>, vector<8x128xf32> -> vector<8x128xf32>
    %c0_3 = arith.constant 0 : index
    %c0_4 = arith.constant 0 : index
    %4 = vector.load %arg3[%c0_3, %c0_4] : memref<1x128xf32, #tpu.memory_space<vmem>>, vector<1x128xf32>
    %5 = vector.broadcast %4 : vector<1x128xf32> to vector<8x128xf32>
    %6 = arith.addf %3, %5 : vector<8x128xf32>
    %cst_5 = arith.constant 0.000000e+00 : f32
    %7 = vector.broadcast %cst_5 : f32 to vector<8x128xf32>
    %8 = arith.maximumf %6, %7 : vector<8x128xf32>
    %9 = arith.truncf %8 : vector<8x128xf32> to vector<8x128xbf16>
    %c0_6 = arith.constant 0 : index
    %c0_7 = arith.constant 0 : index
    %10 = vector.load %arg6[%c0_6, %c0_7] : memref<8x128xbf16, #tpu.memory_space<vmem>>, vector<8x128xbf16>
    tpu.vector_store %arg6[%c0_6, %c0_7], %9 {strides = array<i32>} : memref<8x128xbf16, #tpu.memory_space<vmem>>, vector<8x128xbf16>,
    %c0_8 = arith.constant 0 : index
    %c0_9 = arith.constant 0 : index
    %11 = vector.load %arg4[%c0_8, %c0_9] : memref<128x128xbf16, #tpu.memory_space<vmem>>, vector<128x128xbf16>
    %cst_10 = arith.constant dense<0.000000e+00> : vector<8x128xf32>
    %12 = tpu.matmul %9, %11, %cst_10 {dimension_numbers = #tpu.dot_dimension_numbers<[1], [0], [0], [1], [0, 0, 1, 1], [], []>} : vector<8x128xbf16>, vector<128x128xbf16>, vector<8x128xf32> -> vector<8x128xf32>
    %c0_11 = arith.constant 0 : index
    %c0_12 = arith.constant 0 : index
    %13 = vector.load %arg5[%c0_11, %c0_12] : memref<1x128xf32, #tpu.memory_space<vmem>>, vector<1x128xf32>
    %14 = vector.broadcast %13 : vector<1x128xf32> to vector<8x128xf32>
    %15 = arith.addf %12, %14 : vector<8x128xf32>
    %c0_13 = arith.constant 0 : index
    %c0_14 = arith.constant 0 : index
    %16 = vector.load %arg7[%c0_13, %c0_14] : memref<8x128xf32, #tpu.memory_space<vmem>>, vector<8x128xf32>
    tpu.vector_store %arg7[%c0_13, %c0_14], %15 {strides = array<i32>} : memref<8x128xf32, #tpu.memory_space<vmem>>, vector<8x128xf32>,
    return
  }
  func.func @transform_0(%arg0: i32) -> (i32, i32) {
    %c0_i32 = arith.constant 0 : i32
    %c0_i32_0 = arith.constant 0 : i32
    return %arg0, %c0_i32 : i32, i32
  }
  func.func @transform_1(%arg0: i32) -> (i32, i32) {
    %c0_i32 = arith.constant 0 : i32
    %c0_i32_0 = arith.constant 0 : i32
    %c0_i32_1 = arith.constant 0 : i32
    return %c0_i32, %c0_i32_0 : i32, i32
  }
  func.func @transform_2(%arg0: i32) -> (i32, i32) {
    %c0_i32 = arith.constant 0 : i32
    %c0_i32_0 = arith.constant 0 : i32
    %c0_i32_1 = arith.constant 0 : i32
    return %c0_i32, %c0_i32_0 : i32, i32
  }
  func.func @transform_3(%arg0: i32) -> (i32, i32) {
    %c0_i32 = arith.constant 0 : i32
    %c0_i32_0 = arith.constant 0 : i32
    %c0_i32_1 = arith.constant 0 : i32
    return %c0_i32, %c0_i32_0 : i32, i32
  }
  func.func @transform_4(%arg0: i32) -> (i32, i32) {
    %c0_i32 = arith.constant 0 : i32
    %c0_i32_0 = arith.constant 0 : i32
    %c0_i32_1 = arith.constant 0 : i32
    return %c0_i32, %c0_i32_0 : i32, i32
  }
  func.func @transform_5(%arg0: i32) -> (i32, i32) {
    %c0_i32 = arith.constant 0 : i32
    %c0_i32_0 = arith.constant 0 : i32
    return %arg0, %c0_i32 : i32, i32
  }
  func.func @transform_6(%arg0: i32) -> (i32, i32) {
    %c0_i32 = arith.constant 0 : i32
    %c0_i32_0 = arith.constant 0 : i32
    return %arg0, %c0_i32 : i32, i32
  }
}

</mosaic_0001>

<bundles_post_ra>
// kernel: tpu_custom_call.1
= control target key start
LH: loop header
LB: loop body
LE: loop exit
PB: predicated region body
PF: predicated region fallthrough
CT: control target
= control target key end

     0   :  { %12 = vsyncpa [#allocation3], 0  ;;  %s1384_s0 = inlined_call_operand.hbm [shape: f32[8,1024], index: 0, kind: input, shape index: {}]   ;;  %s1385_s1 = inlined_call_operand.hbm [shape: bf16[1024,128], index: 1, kind: input, shape index: {}]   ;;  %s1386_s2 = inlined_call_operand.vmem [shape: f32[1,128], index: 2, kind: input, shape index: {}]   ;;  %s1387_s3 = inlined_call_operand.hbm [shape: bf16[128,128], index: 3, kind: input, shape index: {}]   ;;  %s1388_s4 = inlined_call_operand.vmem [shape: f32[1,128], index: 4, kind: input, shape index: {}]   ;;  %s1389_s5 = inlined_call_operand.hbm [shape: bf16[8,128], index: 5, kind: output, shape index: {0}]   ;;  %s1390_s6 = inlined_call_operand.hbm [shape: f32[8,128], index: 6, kind: output, shape index: {1}]  }
   0x1   :  { %13 = vsyncpa [#allocation6], 0 }
   0x2   :  { %14 = vsyncpa [#allocation4], 0  ;;  %s31_s23 = sshll.u32 %s1385_s1, 4  ;;  %s32_s23 = int_to_ptr.hbm [resolvable:$true] %s31_s23 }
   0x3   :  { %15 = vsyncpa [#allocation10], 0  ;;  %s1321_s24 = smov [#allocation5]   ;;  %s21_s28 = sshll.u32 %s1384_s0, 4  ;;  %s22_s28 = int_to_ptr.hbm [resolvable:$true] %s21_s28 }
   0x4   :  { %s33_s25 = sshll.u32 %s1321_s24, 4  ;;  %s1322_s29 = smov 64   ;;  %s34_s25 = int_to_ptr.vmem [resolvable:$true] %s33_s25 }
   0x5   :  { %s1323_s30 = smov 4   ;;  %s1324_s7 = smov [#allocation2]  }
   0x6   :  { %39 = dma.hbm_to_vmem [thread:$0]  %s32_s23, 8192, %s34_s25, [#allocation6], %s1322_s29, %s1322_s29, %s1323_s30  }
   0x7   :  { %s23_s8 = sshll.u32 %s1324_s7, 4  ;;  %s46_s11 = sshll.u32 %s1387_s3, 4  ;;  %s24_s8 = int_to_ptr.vmem [resolvable:$true] %s23_s8  ;;  %s47_s11 = int_to_ptr.hbm [resolvable:$true] %s46_s11 }
   0x8   :  { %26 = dma.hbm_to_vmem [thread:$0]  %s22_s28, 1024, %s24_s8, [#allocation3]  }
   0x9   :  { %s1325_s1 = smov [#allocation7]  }
   0xa   :  { %s48_s12 = sshll.u32 %s1325_s1, 4  ;;  %s49_s12 = int_to_ptr.vmem [resolvable:$true] %s48_s12 }
   0xb   :  { %54 = dma.hbm_to_vmem [thread:$0]  %s47_s11, 1024, %s49_s12, [#allocation6], %s1322_s29, %s1322_s29, %s1323_s30  }
   0xc   :  { %1313 = dma.done.wait [#allocation3], 1024  }
   0xd   :  { %1314 = vsyncadd [#allocation3], 4294966272 }
   0xe   :  { %1315 = dma.done.wait [#allocation6], 9216  }
   0xf   :  { %1316 = vsyncadd [#allocation6], 4294958080  ;;  %v1119_v0 = vld [vmem:[#allocation5 + $0x38] sm:$0xff]  ;;  %v1118_v4 = vld [vmem:[#allocation5 + $0x30] sm:$0xff]  ;;  %s797_s16 = sshll.u32 %s1389_s5, 4  ;;  %s1327_s19 = smov [#allocation9]   ;;  %s798_s16 = int_to_ptr.hbm [resolvable:$true] %s797_s16 }
  0x10   :  { %v1127_v1 = vld [vmem:[#allocation5 + $0x78] sm:$0xff]  ;;  %601 = vmatpush.bf16.msra.mxu0 %v1119_v0  ;;  %v1126_v5 = vld [vmem:[#allocation5 + $0x70] sm:$0xff]  ;;  %v1117_v8 = vld [vmem:[#allocation5 + $0x28] sm:$0xff]  ;;  %s806_s20 = sshll.u32 %s1327_s19, 4  ;;  %s808_s23 = sshll.u32 %s1390_s6, 4  ;;  %s807_s20 = int_to_ptr.vmem [resolvable:$true] %s806_s20  ;;  %s809_s23 = int_to_ptr.hbm [resolvable:$true] %s808_s23 }
  0x11   :  { %v1135_v2 = vld [vmem:[#allocation5 + $0xb8] sm:$0xff]  ;;  %614 = vmatpush.bf16.msra.mxu1 %v1127_v1  ;;  %v1134_v6 = vld [vmem:[#allocation5 + $0xb0] sm:$0xff]  ;;  %v1125_v9 = vld [vmem:[#allocation5 + $0x68] sm:$0xff] }
  0x12   :  { %v1143_v3 = vld [vmem:[#allocation5 + $0xf8] sm:$0xff]  ;;  %627 = vmatpush.bf16.msra.mxu2 %v1135_v2  ;;  %v1142_v7 = vld [vmem:[#allocation5 + $0xf0] sm:$0xff]  ;;  %v1133_v10 = vld [vmem:[#allocation5 + $0xa8] sm:$0xff] }
  0x13   :  { %640 = vmatpush.bf16.msra.mxu3 %v1143_v3  ;;  %v1141_v11 = vld [vmem:[#allocation5 + $0xe8] sm:$0xff]  ;;  %v1116_v12 = vld [vmem:[#allocation5 + $0x20] sm:$0xff]  ;;  %v1115_v16 = vld [vmem:[#allocation5 + $0x18] sm:$0xff] }
  0x14   :  { %602 = vmatpush.bf16.msra.mxu0 %v1118_v4  ;;  %v1124_v13 = vld [vmem:[#allocation5 + $0x60] sm:$0xff]  ;;  %v1123_v17 = vld [vmem:[#allocation5 + $0x58] sm:$0xff]  ;;  %v1114_v20 = vld [vmem:[#allocation5 + $0x10] sm:$0xff] }
  0x15   :  { %615 = vmatpush.bf16.msra.mxu1 %v1126_v5  ;;  %v1132_v14 = vld [vmem:[#allocation5 + $0xa0] sm:$0xff]  ;;  %v1131_v18 = vld [vmem:[#allocation5 + $0x98] sm:$0xff]  ;;  %v1122_v21 = vld [vmem:[#allocation5 + $0x50] sm:$0xff] }
  0x16   :  { %628 = vmatpush.bf16.msra.mxu2 %v1134_v6  ;;  %v1140_v15 = vld [vmem:[#allocation5 + $0xe0] sm:$0xff]  ;;  %v1139_v19 = vld [vmem:[#allocation5 + $0xd8] sm:$0xff]  ;;  %v1130_v22 = vld [vmem:[#allocation5 + $0x90] sm:$0xff] }
  0x17   :  { %641 = vmatpush.bf16.msra.mxu3 %v1142_v7  ;;  %v1138_v23 = vld [vmem:[#allocation5 + $0xd0] sm:$0xff]  ;;  %v1113_v24 = vld [vmem:[#allocation5 + $0x8] sm:$0xff]  ;;  %v1112_v28 = vld [vmem:[#allocation5] sm:$0xff] }
  0x18   :  { %603 = vmatpush.bf16.msra.mxu0 %v1117_v8  ;;  %v1121_v25 = vld [vmem:[#allocation5 + $0x48] sm:$0xff]  ;;  %v1120_v29 = vld [vmem:[#allocation5 + $0x40] sm:$0xff]  ;;  %v1151_v32 = vld [vmem:[#allocation5 + $0x138] sm:$0xff] }
  0x19   :  { %616 = vmatpush.bf16.msra.mxu1 %v1125_v9  ;;  %v1129_v26 = vld [vmem:[#allocation5 + $0x88] sm:$0xff]  ;;  %v1128_v30 = vld [vmem:[#allocation5 + $0x80] sm:$0xff]  ;;  %v71_v33 = vld [vmem:[#allocation2 + $0x10] sm:$0xff] }
  0x1a   :  { %629 = vmatpush.bf16.msra.mxu2 %v1133_v10  ;;  %v1137_v27 = vld [vmem:[#allocation5 + $0xc8] sm:$0xff]  ;;  %v1136_v31 = vld [vmem:[#allocation5 + $0xc0] sm:$0xff]  ;;  %v1159_v35 = vld [vmem:[#allocation5 + $0x178] sm:$0xff]  ;;  %v79_v40 = vpack.c.bf16 %v71_v33, %v71_v33 }
  0x1b   :  { %642 = vmatpush.bf16.msra.mxu3 %v1141_v11  ;;  %v69_v34 = vld [vmem:[#allocation2] sm:$0xff]  ;;  %v72_v36 = vld [vmem:[#allocation2 + $0x18] sm:$0xff]  ;;  %v70_v37 = vld [vmem:[#allocation2 + $0x8] sm:$0xff] }
  0x1c   :  { %604 = vmatpush.bf16.msra.mxu0 %v1116_v12  ;;  %v1167_v38 = vld [vmem:[#allocation5 + $0x1b8] sm:$0xff]  ;;  %v77_v41 = vpack.c.bf16 %v69_v34, %v69_v34  ;;  %v80_v42 = vpack.c.bf16 %v72_v36, %v72_v36  ;;  %v78_v43 = vpack.c.bf16 %v70_v37, %v70_v37  ;;  %v1150_v44 = vld [vmem:[#allocation5 + $0x130] sm:$0xff]  ;;  %v1149_v48 = vld [vmem:[#allocation5 + $0x128] sm:$0xff] }
  0x1d   :  { %617 = vmatpush.bf16.msra.mxu1 %v1124_v13  ;;  %v1175_v39 = vld [vmem:[#allocation5 + $0x1f8] sm:$0xff]  ;;  %v1158_v45 = vld [vmem:[#allocation5 + $0x170] sm:$0xff]  ;;  %v1157_v49 = vld [vmem:[#allocation5 + $0x168] sm:$0xff] }
  0x1e   :  { %630 = vmatpush.bf16.msra.mxu2 %v1132_v14  ;;  %v1166_v46 = vld [vmem:[#allocation5 + $0x1b0] sm:$0xff]  ;;  %v1165_v50 = vld [vmem:[#allocation5 + $0x1a8] sm:$0xff]  ;;  %v1148_v52 = vld [vmem:[#allocation5 + $0x120] sm:$0xff] }
  0x1f   :  { %643 = vmatpush.bf16.msra.mxu3 %v1140_v15  ;;  %v1174_v47 = vld [vmem:[#allocation5 + $0x1f0] sm:$0xff]  ;;  %v1173_v51 = vld [vmem:[#allocation5 + $0x1e8] sm:$0xff]  ;;  %v1156_v53 = vld [vmem:[#allocation5 + $0x160] sm:$0xff] }
  0x20   :  { %605 = vmatpush.bf16.msra.mxu0 %v1115_v16  ;;  %v1164_v54 = vld [vmem:[#allocation5 + $0x1a0] sm:$0xff]  ;;  %v1147_v56 = vld [vmem:[#allocation5 + $0x118] sm:$0xff]  ;;  %v1146_v60 = vld [vmem:[#allocation5 + $0x110] sm:$0xff] }
  0x21   :  { %618 = vmatpush.bf16.msra.mxu1 %v1123_v17  ;;  %v1172_v55 = vld [vmem:[#allocation5 + $0x1e0] sm:$0xff]  ;;  %v1155_v57 = vld [vmem:[#allocation5 + $0x158] sm:$0xff]  ;;  %v1154_v61 = vld [vmem:[#allocation5 + $0x150] sm:$0xff] }
  0x22   :  { %631 = vmatpush.bf16.msra.mxu2 %v1131_v18  ;;  %v1163_v58 = vld [vmem:[#allocation5 + $0x198] sm:$0xff]  ;;  %v1162_v62 = vld [vmem:[#allocation5 + $0x190] sm:$0xff]  ;;  %v1145_v0 = vld [vmem:[#allocation5 + $0x108] sm:$0xff] }
  0x23   :  { %644 = vmatpush.bf16.msra.mxu3 %v1139_v19  ;;  %v1171_v59 = vld [vmem:[#allocation5 + $0x1d8] sm:$0xff]  ;;  %v1170_v63 = vld [vmem:[#allocation5 + $0x1d0] sm:$0xff]  ;;  %v1153_v1 = vld [vmem:[#allocation5 + $0x148] sm:$0xff] }
  0x24   :  { %606 = vmatpush.bf16.msra.mxu0 %v1114_v20  ;;  %v1161_v2 = vld [vmem:[#allocation5 + $0x188] sm:$0xff]  ;;  %v1144_v4 = vld [vmem:[#allocation5 + $0x100] sm:$0xff]  ;;  %v75_v10 = vld [vmem:[#allocation2 + $0x30] sm:$0xff] }
  0x25   :  { %619 = vmatpush.bf16.msra.mxu1 %v1122_v21  ;;  %v1169_v3 = vld [vmem:[#allocation5 + $0x1c8] sm:$0xff]  ;;  %v1152_v5 = vld [vmem:[#allocation5 + $0x140] sm:$0xff]  ;;  %v76_v11 = vld [vmem:[#allocation2 + $0x38] sm:$0xff]  ;;  %v83_v14 = vpack.c.bf16 %v75_v10, %v75_v10 }
  0x26   :  { %632 = vmatpush.bf16.msra.mxu2 %v1130_v22  ;;  %v1160_v6 = vld [vmem:[#allocation5 + $0x180] sm:$0xff]  ;;  %v74_v8 = vld [vmem:[#allocation2 + $0x28] sm:$0xff]  ;;  %v84_v15 = vpack.c.bf16 %v76_v11, %v76_v11  ;;  %v1183_v16 = vld [vmem:[#allocation7 + $0x38] sm:$0xff] }
  0x27   :  { %645 = vmatpush.bf16.msra.mxu3 %v1138_v23  ;;  %v73_v7 = vld [vmem:[#allocation2 + $0x20] sm:$0xff]  ;;  %v82_v13 = vpack.c.bf16 %v74_v8, %v74_v8  ;;  %v1182_v17 = vld [vmem:[#allocation7 + $0x30] sm:$0xff]  ;;  %v1181_v18 = vld [vmem:[#allocation7 + $0x28] sm:$0xff] }
  0x28   :  { %607 = vmatpush.bf16.msra.mxu0 %v1113_v24  ;;  %v1168_v9 = vld [vmem:[#allocation5 + $0x1c0] sm:$0xff]  ;;  %v81_v12 = vpack.c.bf16 %v73_v7, %v73_v7  ;;  %v1179_v20 = vld [vmem:[#allocation7 + $0x18] sm:$0xff]  ;;  %v1178_v22 = vld [vmem:[#allocation7 + $0x10] sm:$0xff] }
  0x29   :  { %620 = vmatpush.bf16.msra.mxu1 %v1121_v25  ;;  %v1180_v19 = vld [vmem:[#allocation7 + $0x20] sm:$0xff]  ;;  %v1177_v24 = vld [vmem:[#allocation7 + $0x8] sm:$0xff] }
  0x2a   :  { %633 = vmatpush.bf16.msra.mxu2 %v1129_v26 }
  0x2b   :  { %646 = vmatpush.bf16.msra.mxu3 %v1137_v27 }
  0x2c   :  { %608 = vmatpush.bf16.msra.mxu0 %v1112_v28  ;;  %v1176_v28 = vld [vmem:[#allocation7] sm:$0xff] }
  0x2d   :  { %621 = vmatpush.bf16.msra.mxu1 %v1120_v29 }
  0x2e   :  { %634 = vmatpush.bf16.msra.mxu2 %v1128_v30  ;;  %v1191_v30 = vld [vmem:[%s1386_s2] ss:$0 sm:$0xff]  ;;  %s1326_s2 = smov [#allocation8]  }
  0x2f   :  { %647 = vmatpush.bf16.msra.mxu3 %v1136_v31  ;;  %609 = vmatmul.bf16.vlgmr.msra.gmra.mxu0 %v77_v41  ;;  %s795_s13 = sshll.u32 %s1326_s2, 4  ;;  %s796_s13 = int_to_ptr.vmem [resolvable:$true] %s795_s13 }
  0x30   :  { %653 = vmatpush.bf16.msrb.mxu0 %v1151_v32  ;;  %622 = vmatmul.bf16.vlgmr.msra.gmra.mxu1 %v78_v43 }
  0x31   :  { %666 = vmatpush.bf16.msrb.mxu1 %v1159_v35  ;;  %635 = vmatmul.bf16.vlgmr.msra.gmra.mxu2 %v79_v40 }
  0x32   :  { %679 = vmatpush.bf16.msrb.mxu2 %v1167_v38  ;;  %648 = vmatmul.bf16.vlgmr.msra.gmra.mxu3 %v80_v42 }
  0x33   :  { %692 = vmatpush.bf16.msrb.mxu3 %v1175_v39 }
  0x34   :  { %654 = vmatpush.bf16.msrb.mxu0 %v1150_v44 }
  0x35   :  { %667 = vmatpush.bf16.msrb.mxu1 %v1158_v45 }
  0x36   :  { %680 = vmatpush.bf16.msrb.mxu2 %v1166_v46 }
  0x37   :  { %693 = vmatpush.bf16.msrb.mxu3 %v1174_v47 }
  0x38   :  { %655 = vmatpush.bf16.msrb.mxu0 %v1149_v48 }
  0x39   :  { %668 = vmatpush.bf16.msrb.mxu1 %v1157_v49 }
  0x3a   :  { %681 = vmatpush.bf16.msrb.mxu2 %v1165_v50 }
  0x3b   :  { %694 = vmatpush.bf16.msrb.mxu3 %v1173_v51  ;;  %v1192_v51 = vld [vmem:[%s1388_s4] ss:$0 sm:$0xff] }
  0x3c   :  { %656 = vmatpush.bf16.msrb.mxu0 %v1148_v52 }
  0x3d   :  { %669 = vmatpush.bf16.msrb.mxu1 %v1156_v53 }
  0x3e   :  { %682 = vmatpush.bf16.msrb.mxu2 %v1164_v54 }
  0x3f   :  { %695 = vmatpush.bf16.msrb.mxu3 %v1172_v55 }
  0x40   :  { %657 = vmatpush.bf16.msrb.mxu0 %v1147_v56 }
  0x41   :  { %670 = vmatpush.bf16.msrb.mxu1 %v1155_v57 }
  0x42   :  { %683 = vmatpush.bf16.msrb.mxu2 %v1163_v58 }
  0x43   :  { %696 = vmatpush.bf16.msrb.mxu3 %v1171_v59 }
  0x44   :  { %658 = vmatpush.bf16.msrb.mxu0 %v1146_v60 }
  0x45   :  { %671 = vmatpush.bf16.msrb.mxu1 %v1154_v61 }
  0x46   :  { %684 = vmatpush.bf16.msrb.mxu2 %v1162_v62 }
  0x47   :  { %697 = vmatpush.bf16.msrb.mxu3 %v1170_v63 }
  0x48   :  { %659 = vmatpush.bf16.msrb.mxu0 %v1145_v0 }
  0x49   :  { %672 = vmatpush.bf16.msrb.mxu1 %v1153_v1 }
  0x4a   :  { %685 = vmatpush.bf16.msrb.mxu2 %v1161_v2 }
  0x4b   :  { %698 = vmatpush.bf16.msrb.mxu3 %v1169_v3 }
  0x4c   :  { %660 = vmatpush.bf16.msrb.mxu0 %v1144_v4 }
  0x4d   :  { %673 = vmatpush.bf16.msrb.mxu1 %v1152_v5 }
  0x4e   :  { %686 = vmatpush.bf16.msrb.mxu2 %v1160_v6 }
  0x4f   :  { %699 = vmatpush.bf16.msrb.mxu3 %v1168_v9  ;;  %661 = vmatmul.bf16.vlgmr.msrb.gmra.mxu0 %v81_v12 }
  0x50   :  { %674 = vmatmul.bf16.vlgmr.msrb.gmra.mxu1 %v82_v13  ;;  %776 = vmatpush.bf16.msra.mxu0 %v1183_v16 }
  0x51   :  { %687 = vmatmul.bf16.vlgmr.msrb.gmra.mxu2 %v83_v14 }
  0x52   :  { %700 = vmatmul.bf16.vlgmr.msrb.gmra.mxu3 %v84_v15 }
  0x54   :  { %777 = vmatpush.bf16.msra.mxu0 %v1182_v17 }
  0x58   :  { %778 = vmatpush.bf16.msra.mxu0 %v1181_v18 }
  0x5c   :  { %779 = vmatpush.bf16.msra.mxu0 %v1180_v19 }
  0x60   :  { %780 = vmatpush.bf16.msra.mxu0 %v1179_v20 }
  0x64   :  { %781 = vmatpush.bf16.msra.mxu0 %v1178_v22 }
  0x68   :  { %782 = vmatpush.bf16.msra.mxu0 %v1177_v24 }
  0x6c   :  { %783 = vmatpush.bf16.msra.mxu0 %v1176_v28 }
  0xac   :  { %v610_v21 = vpop.f32.mrf.mxu0 }
  0xad   :  { %v623_v23 = vpop.f32.mrf.mxu1  ;;  %v611_v33 = vadd.f32 %v1191_v30, %v610_v21 }
  0xaf   :  { %v624_v34 = vadd.f32 %v623_v23, %v611_v33 }
  0xb4   :  { %v636_v25 = vpop.f32.mrf.mxu2  ;;  %v612_v27 = vpop.f32.mrf.mxu0 }
  0xb5   :  { %v649_v26 = vpop.f32.mrf.mxu3  ;;  %v625_v29 = vpop.f32.mrf.mxu1  ;;  %v637_v35 = vadd.f32 %v636_v25, %v624_v34 }
  0xb7   :  { %v650_v36 = vadd.f32 %v649_v26, %v637_v35 }
  0xbc   :  { %v638_v31 = vpop.f32.mrf.mxu2 }
  0xbd   :  { %v651_v32 = vpop.f32.mrf.mxu3 }
  0xcc   :  { %v662_v37 = vpop.f32.mrf.mxu0 }
  0xcd   :  { %v675_v38 = vpop.f32.mrf.mxu1  ;;  %v663_v39 = vadd.f32 %v662_v37, %v650_v36 }
  0xcf   :  { %v676_v40 = vadd.f32 %v675_v38, %v663_v39 }
  0xd4   :  { %v688_v41 = vpop.f32.mrf.mxu2  ;;  %v664_v44 = vpop.f32.mrf.mxu0 }
  0xd5   :  { %v701_v42 = vpop.f32.mrf.mxu3  ;;  %v689_v43 = vadd.f32 %v688_v41, %v676_v40  ;;  %v677_v45 = vpop.f32.mrf.mxu1 }
  0xd7   :  { %v702_v46 = vadd.f32 %v701_v42, %v689_v43 }
  0xd9   :  { %v705_v47 = vmax.f32 %v702_v46, 0.0 }
  0xdb   :  { %v706_v48 = vpack.c.bf16 %v705_v47, %v705_v47 }
  0xdc   :  { %v690_v49 = vpop.f32.mrf.mxu2 }
  0xdd   :  { %v703_v50 = vpop.f32.mrf.mxu3  ;;  %707 = vst [vmem:[#allocation8] sm:$0xf] %v706_v48  ;;  %784 = vmatmul.bf16.vlgmr.msra.gmra.mxu0 %v706_v48 }
  0xde   :  { %800 = dma.vmem_to_hbm [thread:$0]  %s796_s13, 64, %s798_s16, [#allocation4]  }
 0x15a   :  { %v785_v52 = vpop.f32.mrf.mxu0 }
 0x15b   :  { %v786_v53 = vadd.f32 %v1192_v51, %v785_v52 }
 0x15d   :  { %789 = vst [vmem:[#allocation9] sm:$0xff] %v786_v53 }
 0x15e   :  { %811 = dma.vmem_to_hbm [thread:$0]  %s807_s20, 128, %s809_s23, [#allocation10]  }
 0x162   :  { %v787_v54 = vpop.f32.mrf.mxu0 }
 0x163   :  { %1317 = dma.done.wait [#allocation4], 64  }
 0x164   :  { %1318 = vsyncadd [#allocation4], 4294967232 }
 0x165   :  { %1319 = dma.done.wait [#allocation10], 128  }
 0x166   :  { %1320 = vsyncadd [#allocation10], 4294967168 }
 0x167   :  { %820 = vsyncpa [#allocation3], 1 }
 0x168   :  { %821 = vsyncpa [#allocation6], 1 }
 0x169   :  { %822 = vsyncpa [#allocation4], 1 }
 0x16a   :  { %823 = vsyncpa [#allocation10], 1 }

</bundles_post_ra>
